<compile_context>
chip_gen: v6e
topology: v6e:2x2x1
jax: 0.10.0
libtpu: 0.0.40
codegen_flags: <defaults>
</compile_context>

<pallas_src>
import numpy as np
import jax
import jax.numpy as jnp
from jax.experimental import pallas as pl
from jax.experimental.pallas import tpu as pltpu

INPUT_DIM = 8
HIDDEN_DIM = 32
OUTPUT_DIM = 4
NODES_PER_GRAPH = 8
NUM_GRAPHS = 2
LANE = 128
SUB = 8


def _round_up(x, m):
    return ((x + m - 1) // m) * m


# --------------------- host-side glue (cayley_utils stand-in) ---------------------
def _is_prime(p):
    if p < 2:
        return False
    for d in range(2, int(p ** 0.5) + 1):
        if p % d == 0:
            return False
    return True


def _sl2_size(n):
    # |SL(2, Z_n)| = n^3 * prod_{p | n, p prime} (1 - 1/p^2)
    size = n ** 3
    for p in range(2, n + 1):
        if n % p == 0 and _is_prime(p):
            size = size * (p * p - 1) // (p * p)
    return size


def calculate_optimal_virtual_nodes(num_base_nodes):
    # TODO(synk): deterministic stand-in for models.cayley_utils.calculate_optimal_virtual_nodes.
    n = 2
    while _sl2_size(n) < num_base_nodes:
        n += 1
    cayley_size = _sl2_size(n)
    num_virtual = cayley_size - num_base_nodes
    if num_virtual <= 0:
        num_virtual = cayley_size
    return num_virtual, n


def build_gcn_adjacency(num_nodes, edges):
    """Dense GCNConv propagation matrix: D^{-1/2} (A + I) D^{-1/2}."""
    A = np.zeros((num_nodes, num_nodes), np.float32)
    for i, j in edges:
        A[i, j] = 1.0
        A[j, i] = 1.0
    A = A + np.eye(num_nodes, dtype=np.float32)  # add_self_loops=True
    deg = A.sum(axis=1)
    d_inv_sqrt = 1.0 / np.sqrt(deg)
    return (A * d_inv_sqrt[:, None]) * d_inv_sqrt[None, :]


def _block_diag(blocks):
    """Dense block-diagonal assembly (host side)."""
    n = len(blocks)
    rows = []
    for i, b in enumerate(blocks):
        row = [b if j == i else jnp.zeros((b.shape[0], blocks[j].shape[1]), b.dtype)
               for j in range(n)]
        rows.append(jnp.concatenate(row, axis=1))
    return jnp.concatenate(rows, axis=0)


# ---------------------------------- Pallas kernel ----------------------------------
def _make_kernel(dims):
    (GN, GV, Din, H, out_pad, out_rows,
     rx, ra, re, rr, pw, pb, pv1, pf, pm2) = dims

    def kernel(d_ref, p_ref, out_ref):
        f32 = jnp.float32

        # ---- carve the two slabs (static slices of VMEM-resident refs) ----
        x = d_ref[rx:rx + GN, 0:Din]              # (G*Nn, Din)  node features
        a_bd = d_ref[ra:ra + GN, 0:GN]            # block-diag GCN propagation matrix
        ewt = d_ref[re:re + GV, 0:GN]             # block-diag ew^T (virtual aggregation)
        r = d_ref[rr:rr + out_rows, 0:GV]         # mean-readout matrix (rows >= G zero)

        w_fused = p_ref[pw:pw + Din, 0:H]         # W_emb @ W_gcn
        wv1 = p_ref[pv1:pv1 + H, 0:H]             # virtual_node_mlp[0]
        w_fold = p_ref[pf:pf + H, 0:H]            # wv2 @ wm1
        wm2 = p_ref[pm2:pm2 + H, 0:out_pad]       # mlp[2] (zero-padded lanes)
        biases = p_ref[pb:pb + SUB, 0:out_pad]    # one aligned load for all bias rows
        b_fused = biases[0:1, 0:H]                # b_emb @ W_gcn
        b_gcn = biases[1:2, 0:H]
        b_v1 = biases[2:3, 0:H]
        b_fold = biases[3:4, 0:H]                 # bv2 @ wm1 + bm1
        b_m2 = biases[4:5, 0:out_pad]

        # node_embedding folded into conv1's linear: (x @ W_emb + b_emb) @ W_gcn
        hw = jnp.dot(x, w_fused, preferred_element_type=f32) + b_fused
        # conv1 propagation over ALL graphs at once: relu(A_blockdiag @ hw + b_gcn)
        h1 = jnp.maximum(jnp.dot(a_bd, hw, preferred_element_type=f32) + b_gcn, 0.0)

        # NOTE: the PyTorch forward also computes an affinity/attention branch whose
        # result (`modified_weights`) is never consumed; it is dead code and omitted.

        # virtual-node aggregation for all graphs: block-diag(ew^T) @ h1 -> (G*V, H)
        v = jnp.dot(ewt, h1, preferred_element_type=f32)
        # virtual_node_mlp layer 1 (layer 2 is folded through the linear readout below)
        v = jnp.maximum(jnp.dot(v, wv1, preferred_element_type=f32) + b_v1, 0.0)

        # per-graph mean readout pulled in front of the folded (wv2 @ wm1) layer
        g = jnp.dot(r, v, preferred_element_type=f32)                 # (out_rows, H)
        o = jnp.maximum(jnp.dot(g, w_fold, preferred_element_type=f32) + b_fold, 0.0)

        # output layer; store is one full (out_rows, out_pad) tile -> unmasked vst
        out_ref[...] = jnp.dot(o, wm2, preferred_element_type=f32) + b_m2

    return kernel


def balanced_iprmpnn_forward(x_g, a_g, ew_g, params):
    """x_g: (G, Nn, Din), a_g: (G, Nn, Nn), ew_g: (G, Nn, V) -> (G, output_dim)."""
    G, Nn, Din = x_g.shape
    V = ew_g.shape[2]
    H = params["w_gcn"].shape[1]
    Dout = params["wm2"].shape[1]

    GN, GV = G * Nn, G * V
    out_pad = _round_up(max(Dout, 1), LANE)   # lane-dense, multiple of 128
    out_rows = _round_up(max(G, 1), SUB)      # full-sublane output tile

    # ---------------- host-side algebraic folds (constant w.r.t. the kernel) ----------
    w_fused = params["w_emb"] @ params["w_gcn"]                    # (Din, H)
    b_fused = params["b_emb"] @ params["w_gcn"]                    # (1, H)
    w_fold = params["wv2"] @ params["wm1"]                         # (H, H)
    b_fold = params["bv2"] @ params["wm1"] + params["bm1"]         # (1, H)

    x_flat = x_g.reshape(GN, Din)
    a_bd = _block_diag([a_g[g] for g in range(G)])                 # (GN, GN)
    ew_bd_t = _block_diag([ew_g[g].T for g in range(G)])           # (GV, GN)
    readout = _block_diag([jnp.full((1, V), 1.0 / V, jnp.float32)
                           for _ in range(G)])                     # (G, GV)

    # ---------------- pack everything into two lane-dense slabs (2 DMAs total) --------
    rx = 0
    ra = _round_up(rx + GN, SUB)
    re = _round_up(ra + GN, SUB)
    rr = _round_up(re + GV, SUB)
    rows_d = _round_up(rr + out_rows, SUB)
    data = jnp.zeros((rows_d, out_pad), jnp.float32)
    data = data.at[rx:rx + GN, :Din].set(x_flat)
    data = data.at[ra:ra + GN, :GN].set(a_bd)
    data = data.at[re:re + GV, :GN].set(ew_bd_t)
    data = data.at[rr:rr + G, :GV].set(readout)

    pw = 0
    pb = _round_up(pw + Din, SUB)     # 8-row bias block (aligned single load)
    pv1 = pb + SUB
    pf = _round_up(pv1 + H, SUB)
    pm2 = _round_up(pf + H, SUB)
    rows_p = _round_up(pm2 + H, SUB)
    prm = jnp.zeros((rows_p, out_pad), jnp.float32)
    prm = prm.at[pw:pw + Din, :H].set(w_fused)
    prm = prm.at[pb + 0, :H].set(b_fused[0])
    prm = prm.at[pb + 1, :H].set(params["b_gcn"][0])
    prm = prm.at[pb + 2, :H].set(params["bv1"][0])
    prm = prm.at[pb + 3, :H].set(b_fold[0])
    prm = prm.at[pb + 4, :Dout].set(params["bm2"][0])
    prm = prm.at[pv1:pv1 + H, :H].set(params["wv1"])
    prm = prm.at[pf:pf + H, :H].set(w_fold)
    prm = prm.at[pm2:pm2 + H, :Dout].set(params["wm2"])

    kernel = _make_kernel((GN, GV, Din, H, out_pad, out_rows,
                           rx, ra, re, rr, pw, pb, pv1, pf, pm2))

    # TODO(synk): block-diag formulation is O(G^2) in VMEM/MXU work; switch to a
    # grid=(G,) per-graph variant (dimension_semantics=("parallel",), shards across
    # v7x's two TensorCores) before scaling the number of graphs.
    out = pl.pallas_call(
        kernel,
        out_shape=jax.ShapeDtypeStruct((out_rows, out_pad), jnp.float32),
        in_specs=[pl.BlockSpec(memory_space=pltpu.MemorySpace.VMEM),
                  pl.BlockSpec(memory_space=pltpu.MemorySpace.VMEM)],
        out_specs=pl.BlockSpec(memory_space=pltpu.MemorySpace.VMEM),
    )(data, prm)

    return out[:G, :Dout]


# --------------------------- deterministic parameter init ---------------------------
def init_params(key, din, h, dout):
    ks = jax.random.split(key, 8)

    def lin(k, fan_in, fan_out):
        scale = 1.0 / np.sqrt(fan_in)
        kw, kb = jax.random.split(k)
        w = jax.random.uniform(kw, (fan_in, fan_out), jnp.float32, -scale, scale)
        b = jax.random.uniform(kb, (1, fan_out), jnp.float32, -scale, scale)
        return w, b

    p = {}
    p["w_emb"], p["b_emb"] = lin(ks[0], din, h)   # node_embedding
    p["w_gcn"], p["b_gcn"] = lin(ks[1], h, h)     # conv1 (conv2 is unused in forward)
    p["wa1"], p["ba1"] = lin(ks[2], h, h)         # affinity_mlp[0]  (dead branch)
    p["wa2"], p["ba2"] = lin(ks[3], h, h)         # affinity_mlp[2]  (dead branch)
    p["wv1"], p["bv1"] = lin(ks[4], h, h)         # virtual_node_mlp[0]
    p["wv2"], p["bv2"] = lin(ks[5], h, h)         # virtual_node_mlp[2]
    p["wm1"], p["bm1"] = lin(ks[6], h, h)         # mlp[0]
    p["wm2"], p["bm2"] = lin(ks[7], h, dout)      # mlp[2]
    return p


# -------------------------------- pure-JAX reference --------------------------------
def reference_forward(x_g, a_g, ew_g, p):
    h0 = jnp.einsum("gnd,dh->gnh", x_g, p["w_emb"]) + p["b_emb"]
    h1 = jax.nn.relu(
        jnp.einsum("gnm,gmh->gnh", a_g, jnp.einsum("gnh,hk->gnk", h0, p["w_gcn"]))
        + p["b_gcn"])
    v = jnp.einsum("gnv,gnh->gvh", ew_g, h1)
    v = jax.nn.relu(jnp.einsum("gvh,hk->gvk", v, p["wv1"]) + p["bv1"])
    v = jnp.einsum("gvh,hk->gvk", v, p["wv2"]) + p["bv2"]
    gfeat = v.mean(axis=1)
    o = jax.nn.relu(gfeat @ p["wm1"] + p["bm1"])
    return o @ p["wm2"] + p["bm2"]


if __name__ == "__main__":
    key = jax.random.PRNGKey(0)
    k_x, k_p = jax.random.split(key)

    G, Nn = NUM_GRAPHS, NODES_PER_GRAPH

    # Equivalent PyG-style inputs: x (G*Nn, input_dim), batch = [0]*Nn + [1]*Nn,
    # each graph an Nn-node ring.
    x = jax.random.normal(k_x, (G * Nn, INPUT_DIM), jnp.float32)
    batch = np.repeat(np.arange(G), Nn)  # noqa: F841  (kept for PyG correspondence)
    ring_edges = [(i, (i + 1) % Nn) for i in range(Nn)]

    x_g = x.reshape(G, Nn, INPUT_DIM)
    a_single = build_gcn_adjacency(Nn, ring_edges)
    a_g = jnp.asarray(np.stack([a_single] * G, axis=0))

    V, _cayley_n = calculate_optimal_virtual_nodes(Nn)
    # edge_init_type='uniform' (default): ones(num_nodes, num_virtual_nodes) / V
    ew_g = jnp.full((G, Nn, V), 1.0 / V, jnp.float32)

    params = init_params(k_p, INPUT_DIM, HIDDEN_DIM, OUTPUT_DIM)

    out = balanced_iprmpnn_forward(x_g, a_g, ew_g, params)
    out = jax.block_until_ready(out)

    ref = reference_forward(x_g, a_g, ew_g, params)
    np.testing.assert_allclose(np.asarray(out), np.asarray(ref), rtol=1e-4, atol=1e-4)
    print("KERNEL_OK")
</pallas_src>

<mosaic_0001>
module attributes {stable_mosaic.version = 11 : i64} {
  func.func @kernel(%arg0: memref<72x128xf32, #tpu.memory_space<vmem>>, %arg1: memref<112x128xf32, #tpu.memory_space<vmem>>, %arg2: memref<8x128xf32, #tpu.memory_space<vmem>>) attributes {dimension_semantics = [], scalar_prefetch = 0 : i64, scratch_operands = 0 : i64, tpu.core_type = #tpu.core_type<tc>} {
    %c0 = arith.constant 0 : index
    %c0_0 = arith.constant 0 : index
    %0 = vector.load %arg0[%c0, %c0_0] : memref<72x128xf32, #tpu.memory_space<vmem>>, vector<16x8xf32>
    %c16 = arith.constant 16 : index
    %c0_1 = arith.constant 0 : index
    %1 = vector.load %arg0[%c16, %c0_1] : memref<72x128xf32, #tpu.memory_space<vmem>>, vector<16x16xf32>
    %c32 = arith.constant 32 : index
    %c0_2 = arith.constant 0 : index
    %2 = vector.load %arg0[%c32, %c0_2] : memref<72x128xf32, #tpu.memory_space<vmem>>, vector<32x16xf32>
    %c64 = arith.constant 64 : index
    %c0_3 = arith.constant 0 : index
    %3 = vector.load %arg0[%c64, %c0_3] : memref<72x128xf32, #tpu.memory_space<vmem>>, vector<8x32xf32>
    %c0_4 = arith.constant 0 : index
    %c0_5 = arith.constant 0 : index
    %4 = vector.load %arg1[%c0_4, %c0_5] : memref<112x128xf32, #tpu.memory_space<vmem>>, vector<8x32xf32>
    %c16_6 = arith.constant 16 : index
    %c0_7 = arith.constant 0 : index
    %5 = vector.load %arg1[%c16_6, %c0_7] : memref<112x128xf32, #tpu.memory_space<vmem>>, vector<32x32xf32>
    %c48 = arith.constant 48 : index
    %c0_8 = arith.constant 0 : index
    %6 = vector.load %arg1[%c48, %c0_8] : memref<112x128xf32, #tpu.memory_space<vmem>>, vector<32x32xf32>
    %c80 = arith.constant 80 : index
    %c0_9 = arith.constant 0 : index
    %7 = vector.load %arg1[%c80, %c0_9] : memref<112x128xf32, #tpu.memory_space<vmem>>, vector<32x128xf32>
    %c8 = arith.constant 8 : index
    %c0_10 = arith.constant 0 : index
    %8 = vector.load %arg1[%c8, %c0_10] : memref<112x128xf32, #tpu.memory_space<vmem>>, vector<8x128xf32>
    %9 = vector.extract_strided_slice %8 {offsets = [0, 0], sizes = [1, 32], strides = [1, 1]} : vector<8x128xf32> to vector<1x32xf32>
    %10 = vector.extract_strided_slice %8 {offsets = [1, 0], sizes = [1, 32], strides = [1, 1]} : vector<8x128xf32> to vector<1x32xf32>
    %11 = vector.extract_strided_slice %8 {offsets = [2, 0], sizes = [1, 32], strides = [1, 1]} : vector<8x128xf32> to vector<1x32xf32>
    %12 = vector.extract_strided_slice %8 {offsets = [3, 0], sizes = [1, 32], strides = [1, 1]} : vector<8x128xf32> to vector<1x32xf32>
    %13 = vector.extract_strided_slice %8 {offsets = [4, 0], sizes = [1, 128], strides = [1, 1]} : vector<8x128xf32> to vector<1x128xf32>
    %cst = arith.constant dense<0.000000e+00> : vector<16x32xf32>
    %14 = tpu.matmul %0, %4, %cst {dimension_numbers = #tpu.dot_dimension_numbers<[1], [0], [0], [1], [0, 0, 1, 1], [], []>} : vector<16x8xf32>, vector<8x32xf32>, vector<16x32xf32> -> vector<16x32xf32>
    %15 = vector.broadcast %9 : vector<1x32xf32> to vector<16x32xf32>
    %16 = arith.addf %14, %15 : vector<16x32xf32>
    %cst_11 = arith.constant dense<0.000000e+00> : vector<16x32xf32>
    %17 = tpu.matmul %1, %16, %cst_11 {dimension_numbers = #tpu.dot_dimension_numbers<[1], [0], [0], [1], [0, 0, 1, 1], [], []>} : vector<16x16xf32>, vector<16x32xf32>, vector<16x32xf32> -> vector<16x32xf32>
    %18 = vector.broadcast %10 : vector<1x32xf32> to vector<16x32xf32>
    %19 = arith.addf %17, %18 : vector<16x32xf32>
    %cst_12 = arith.constant 0.000000e+00 : f32
    %20 = vector.broadcast %cst_12 : f32 to vector<16x32xf32>
    %21 = arith.maximumf %19, %20 : vector<16x32xf32>
    %cst_13 = arith.constant dense<0.000000e+00> : vector<32x32xf32>
    %22 = tpu.matmul %2, %21, %cst_13 {dimension_numbers = #tpu.dot_dimension_numbers<[1], [0], [0], [1], [0, 0, 1, 1], [], []>} : vector<32x16xf32>, vector<16x32xf32>, vector<32x32xf32> -> vector<32x32xf32>
    %cst_14 = arith.constant dense<0.000000e+00> : vector<32x32xf32>
    %23 = tpu.matmul %22, %5, %cst_14 {dimension_numbers = #tpu.dot_dimension_numbers<[1], [0], [0], [1], [0, 0, 1, 1], [], []>} : vector<32x32xf32>, vector<32x32xf32>, vector<32x32xf32> -> vector<32x32xf32>
    %24 = vector.broadcast %11 : vector<1x32xf32> to vector<32x32xf32>
    %25 = arith.addf %23, %24 : vector<32x32xf32>
    %cst_15 = arith.constant 0.000000e+00 : f32
    %26 = vector.broadcast %cst_15 : f32 to vector<32x32xf32>
    %27 = arith.maximumf %25, %26 : vector<32x32xf32>
    %cst_16 = arith.constant dense<0.000000e+00> : vector<8x32xf32>
    %28 = tpu.matmul %3, %27, %cst_16 {dimension_numbers = #tpu.dot_dimension_numbers<[1], [0], [0], [1], [0, 0, 1, 1], [], []>} : vector<8x32xf32>, vector<32x32xf32>, vector<8x32xf32> -> vector<8x32xf32>
    %cst_17 = arith.constant dense<0.000000e+00> : vector<8x32xf32>
    %29 = tpu.matmul %28, %6, %cst_17 {dimension_numbers = #tpu.dot_dimension_numbers<[1], [0], [0], [1], [0, 0, 1, 1], [], []>} : vector<8x32xf32>, vector<32x32xf32>, vector<8x32xf32> -> vector<8x32xf32>
    %30 = vector.broadcast %12 : vector<1x32xf32> to vector<8x32xf32>
    %31 = arith.addf %29, %30 : vector<8x32xf32>
    %cst_18 = arith.constant 0.000000e+00 : f32
    %32 = vector.broadcast %cst_18 : f32 to vector<8x32xf32>
    %33 = arith.maximumf %31, %32 : vector<8x32xf32>
    %cst_19 = arith.constant dense<0.000000e+00> : vector<8x128xf32>
    %34 = tpu.matmul %33, %7, %cst_19 {dimension_numbers = #tpu.dot_dimension_numbers<[1], [0], [0], [1], [0, 0, 1, 1], [], []>} : vector<8x32xf32>, vector<32x128xf32>, vector<8x128xf32> -> vector<8x128xf32>
    %35 = vector.broadcast %13 : vector<1x128xf32> to vector<8x128xf32>
    %36 = arith.addf %34, %35 : vector<8x128xf32>
    %c0_20 = arith.constant 0 : index
    %c0_21 = arith.constant 0 : index
    %37 = vector.load %arg2[%c0_20, %c0_21] : memref<8x128xf32, #tpu.memory_space<vmem>>, vector<8x128xf32>
    tpu.vector_store %arg2[%c0_20, %c0_21], %36 {strides = array<i32>} : memref<8x128xf32, #tpu.memory_space<vmem>>, vector<8x128xf32>,
    return
  }
}

</mosaic_0001>

<bundles_post_ra>
// kernel: tpu_custom_call.1
= control target key start
LH: loop header
LB: loop body
LE: loop exit
PB: predicated region body
PF: predicated region fallthrough
CT: control target
= control target key end

     0   :  { %7 = vsyncpa [#allocation3], 0  ;;  %s939_s0 = inlined_call_operand.hbm [shape: f32[72,128], index: 0, kind: input, shape index: {}]   ;;  %s940_s1 = inlined_call_operand.hbm [shape: f32[112,128], index: 1, kind: input, shape index: {}]   ;;  %s941_s2 = inlined_call_operand.hbm [shape: f32[8,128], index: 2, kind: output, shape index: {}]  }
   0x1   :  { %8 = vsyncpa [#allocation6], 0 }
   0x2   :  { %9 = vsyncpa [#allocation4], 0  ;;  %s878_s9 = smov [#allocation2]  }
   0x3   :  { %s15_s10 = sshll.u32 %s878_s9, 4  ;;  %s16_s10 = int_to_ptr.vmem [resolvable:$true] %s15_s10 }
   0x4   :  { %s820_s11 = scalar_lea.vmem %s16_s10, 1152  ;;  %p825_p1 = scmp.lt.s32.totalorder %s16_s10, %s16_s10 }
   0x5   :  { %p821_p0 = scmp.ne.s32.totalorder %s16_s10, %s820_s11  ;;  %p826_p2 = scmp.lt.s32.totalorder %s820_s11, %s820_s11 }
   0x7   :  { %p827_p3 = por %p826_p2, %p825_p1 }
   0x9   :  { %p828_p4 = pnand %p827_p3, %p821_p0 }
   0xb   :  { %831 = shalt.err (!%p828_p4)
}
   0xc   :  { %s879_s12 = smov 128   ;;  %s880_s13 = smov 8  }
   0xd   :  { %21 = dma.hbm_to_vmem [thread:$0]  %s939_s0, 1152, %s16_s10, [#allocation3], %s879_s12, %s879_s12, %s880_s13  }
   0xe   :  { %s881_s16 = smov [#allocation5]  }
   0xf   :  { %s27_s17 = sshll.u32 %s881_s16, 4  ;;  %s28_s17 = int_to_ptr.vmem [resolvable:$true] %s27_s17 }
  0x10   :  { %s840_s18 = scalar_lea.vmem %s28_s17, 1792  ;;  %p845_p6 = scmp.lt.s32.totalorder %s28_s17, %s28_s17 }
  0x11   :  { %p841_p5 = scmp.ne.s32.totalorder %s28_s17, %s840_s18  ;;  %p846_p7 = scmp.lt.s32.totalorder %s840_s18, %s840_s18 }
  0x13   :  { %p847_p8 = por %p846_p7, %p845_p6 }
  0x15   :  { %p848_p9 = pnand %p847_p8, %p841_p5 }
  0x17   :  { %851 = shalt.err (!%p848_p9)
}
  0x18   :  { %33 = dma.hbm_to_vmem [thread:$0]  %s940_s1, 1792, %s28_s17, [#allocation6], %s879_s12, %s879_s12, %s880_s13  }
  0x19   :  { %872 = dma.done.wait [#allocation3], 1152  }
  0x1a   :  { %873 = vsyncadd [#allocation3], 4294966144 }
  0x1b   :  { %874 = dma.done.wait [#allocation6], 1792  }
  0x1c   :  { %875 = vsyncadd [#allocation6], 4294965504  ;;  %vm67_vm0 = vcmask 64512   ;;  %v49_v0 = vld [vmem:[#allocation5] sm:$0xff]  ;;  %v40_v1 = vld [vmem:[#allocation2] sm:$0xff]  ;;  %vm153_vm1 = vcmask 130048   ;;  %v63_v4 = vlaneseq }
  0x1d   :  { %v41_v2 = vld [vmem:[#allocation2 + $0x8] sm:$0xff]  ;;  %736 = vmatprep.subr.mxu0 %v49_v0  ;;  %738 = vmatprep.mubr.msk.f32.mxu0 %vm67_vm0, %v40_v1  ;;  %v42_v3 = vld [vmem:[#allocation2 + $0x10] sm:$0xff]  ;;  %v43_v13 = vld [vmem:[#allocation2 + $0x18] sm:$0xff]  ;;  %vm338_vm2 = vcmask 261120   ;;  %v882_v34 = vmov 0.0   ;;  %vm883_vm3 = vmmov 0  }
  0x1e   :  { %737 = vmatpush3.msra.mxu0 %v49_v0  ;;  %745 = vmatprep.mubr.msk.f32.mxu1 %vm153_vm1, %v42_v3  ;;  %v907_v5 = vshrl.u32 %v63_v4, 7  ;;  %v910_v7 = vld [vmem:[#allocation5 + $0x8] sm:$0xff]  ;;  %v44_v14 = vld [vmem:[#allocation2 + $0x20] sm:$0xff]  ;;  %v52_v16 = vld [vmem:[#allocation5 + $0x20] sm:$0xff]  ;;  %s884_s0 = smov [#allocation7]  }
  0x1f   :  { %739 = vmatmul.mubr.msk.f32.vlgmr.msra.gmra.mxu0 %vm67_vm0, %v41_v2  ;;  %v53_v15 = vld [vmem:[#allocation5 + $0x28] sm:$0xff]  ;;  %v45_v25 = vld [vmem:[#allocation2 + $0x28] sm:$0xff]  ;;  %v47_v27 = vld [vmem:[#allocation2 + $0x38] sm:$0xff]  ;;  %s675_s1 = sshll.u32 %s884_s0, 4  ;;  %s676_s1 = int_to_ptr.vmem [resolvable:$true] %s675_s1 }
  0x20   :  { %v65_v6 = vsub.s32 0, %v907_v5  ;;  %752 = vmatprep.mubr.msk.f32.mxu0 %vm153_vm1, %v44_v14  ;;  %v151_v17 = vsub.s32 1, %v907_v5  ;;  %v46_v26 = vld [vmem:[#allocation2 + $0x30] sm:$0xff]  ;;  %v51_v28 = vld [vmem:[#allocation5 + $0x18] sm:$0xff]  ;;  %v50_v29 = vld [vmem:[#allocation5 + $0x10] sm:$0xff]  ;;  %v336_v38 = vsub.s32 2, %v907_v5  ;;  %p857_p11 = scmp.lt.s32.totalorder %s676_s1, %s676_s1 }
  0x21   :  { %v57_v35 = vld [vmem:[#allocation5 + $0x48] sm:$0xff]  ;;  %v56_v36 = vld [vmem:[#allocation5 + $0x40] sm:$0xff]  ;;  %v55_v37 = vld [vmem:[#allocation5 + $0x38] sm:$0xff]  ;;  %v515_v60 = vsub.s32 3, %v907_v5  ;;  %v593_v2 = vsub.s32 4, %v907_v5  ;;  %s852_s21 = scalar_lea.vmem %s676_s1, 128 }
  0x22   :  { %v66_v8 = vrot.slane %v910_v7, %v65_v6  ;;  %v152_v18 = vrot.slane %v910_v7, %v151_v17  ;;  %v337_v41 = vrot.slane %v910_v7, %v336_v38  ;;  %v48_v52 = vld [vmem:[#allocation2 + $0x40] sm:$0xff]  ;;  %v54_v53 = vld [vmem:[#allocation5 + $0x30] sm:$0xff]  ;;  %v61_v54 = vld [vmem:[#allocation5 + $0x68] sm:$0xff]  ;;  %p853_p10 = scmp.ne.s32.totalorder %s676_s1, %s852_s21  ;;  %p858_p12 = scmp.lt.s32.totalorder %s852_s21, %s852_s21 }
  0x23   :  { %v60_v57 = vld [vmem:[#allocation5 + $0x60] sm:$0xff]  ;;  %v59_v58 = vld [vmem:[#allocation5 + $0x58] sm:$0xff]  ;;  %v58_v59 = vld [vmem:[#allocation5 + $0x50] sm:$0xff]  ;;  %v516_v61 = vrot.slane %v910_v7, %v515_v60  ;;  %v594_v3 = vrot.slane %v910_v7, %v593_v2 }
  0x24   :  { %p859_p13 = por %p858_p12, %p857_p11 }
  0x26   :  { %p860_p0 = pnand %p859_p13, %p853_p10 }
  0xdf   :  { %v740_v9 = vpop.f32.mrf.mxu0 }
  0xe0   :  { %v146_v10 = vadd.f32 %v740_v9, %v66_v8 }
  0xe1   :  { %v140_v11 = vpop.f32.mrf.mxu0 }
  0xe2   :  { %v141_v12 = vadd.f32 %v140_v11, %v66_v8  ;;  %741 = vmatprep.subr.mxu1 %v146_v10 }
  0xe3   :  { %742 = vmatpush3.msra.mxu1 %v146_v10 }
  0xe4   :  { %743 = vmatprep.subr.mxu1 %v141_v12 }
  0xe5   :  { %744 = vmatpush3.msra.mxu1 %v141_v12 }
  0xe6   :  { %746 = vmatmul.mubr.msk.f32.vlgmr.msra.gmra.mxu1 %vm153_vm1, %v43_v13  ;;  %758 = vmatprep.subr.mxu1 %v53_v15 }
  0xe7   :  { %759 = vmatpush3.msra.mxu1 %v53_v15 }
  0xe8   :  { %760 = vmatprep.subr.mxu1 %v52_v16 }
  0xe9   :  { %761 = vmatpush3.msra.mxu1 %v52_v16 }
  0xea   :  { %762 = vmatprep.subr.mxu1 %v51_v28 }
  0xeb   :  { %763 = vmatpush3.msra.mxu1 %v51_v28 }
  0xec   :  { %764 = vmatprep.subr.mxu1 %v50_v29 }
  0xed   :  { %765 = vmatpush3.msra.mxu1 %v50_v29 }
  0xee   :  { %783 = vmatprep.subr.mxu1 %v882_v34 }
 0x1a6   :  { %v747_v19 = vpop.f32.mrf.mxu1 }
 0x1a7   :  { %v232_v20 = vadd.f32 %v747_v19, %v152_v18 }
 0x1a8   :  { %v226_v21 = vpop.f32.mrf.mxu1 }
 0x1a9   :  { %v236_v22 = vmax.f32 %v232_v20, 0.0  ;;  %v227_v23 = vadd.f32 %v226_v21, %v152_v18 }
 0x1ab   :  { %v235_v24 = vmax.f32 %v227_v23, 0.0  ;;  %748 = vmatprep.subr.mxu0 %v236_v22 }
 0x1ac   :  { %749 = vmatpush3.msra.mxu0 %v236_v22 }
 0x1ad   :  { %750 = vmatprep.subr.mxu0 %v235_v24 }
 0x1ae   :  { %751 = vmatpush3.msra.mxu0 %v235_v24 }
 0x1af   :  { %753 = vmatmul.mubr.msk.f32.vlgmr.msra.gmra.mxu0 %vm153_vm1, %v45_v25  ;;  %772 = vmatprep.subr.mxu0 %v882_v34 }
 0x1b0   :  { %755 = vmatprep.mubr.msk.f32.mxu0 %vm153_vm1, %v46_v26 }
 0x1b3   :  { %756 = vmatmul.mubr.msk.f32.gmra.mxu0 %vm153_vm1, %v47_v27 }
 0x1b4   :  { %780 = vmatprep.mubr.msk.f32.mxu0 %vm883_vm3, %v882_v34 }
 0x26f   :  { %v754_v30 = vpop.f32.mrf.mxu0 }
 0x271   :  { %v315_v31 = vpop.f32.mrf.mxu0 }
 0x272   :  { %766 = vmatprep.mubr.msk.f32.mxu1 %vm338_vm2, %v315_v31 }
 0x273   :  { %v757_v32 = vpop.f32.mrf.mxu0  ;;  %767 = vmatmul.mubr.msk.f32.vlgmr.msra.gmra.mxu1 %vm338_vm2, %v754_v30 }
 0x274   :  { %784 = vmatpush3.msra.mxu1 %v57_v35 }
 0x275   :  { %v325_v33 = vpop.f32.mrf.mxu0  ;;  %785 = vmatprep.subr.mxu1 %v882_v34 }
 0x276   :  { %769 = vmatprep.mubr.msk.f32.mxu1 %vm338_vm2, %v325_v33  ;;  %786 = vmatpush3.msra.mxu1 %v56_v36 }
 0x277   :  { %770 = vmatmul.mubr.msk.f32.gmra.mxu1 %vm338_vm2, %v757_v32  ;;  %787 = vmatprep.subr.mxu1 %v882_v34 }
 0x278   :  { %791 = vmatprep.mubr.msk.f32.mxu1 %vm883_vm3, %v882_v34  ;;  %788 = vmatpush3.msra.mxu1 %v55_v37 }
 0x279   :  { %789 = vmatprep.subr.mxu1 %v882_v34 }
 0x27a   :  { %790 = vmatpush3.msra.mxu1 %v54_v53 }
 0x333   :  { %v768_v39 = vpop.f32.mrf.mxu1 }
 0x334   :  { %v423_v45 = vadd.f32 %v768_v39, %v337_v41 }
 0x335   :  { %v417_v40 = vpop.f32.mrf.mxu1 }
 0x336   :  { %v418_v48 = vadd.f32 %v417_v40, %v337_v41  ;;  %v437_v50 = vmax.f32 %v423_v45, 0.0 }
 0x337   :  { %v771_v42 = vpop.f32.mrf.mxu1 }
 0x338   :  { %v433_v43 = vadd.f32 %v771_v42, %v337_v41  ;;  %v436_v51 = vmax.f32 %v418_v48, 0.0 }
 0x339   :  { %v427_v44 = vpop.f32.mrf.mxu1 }
 0x33a   :  { %v439_v46 = vmax.f32 %v433_v43, 0.0  ;;  %v428_v47 = vadd.f32 %v427_v44, %v337_v41 }
 0x33c   :  { %v438_v49 = vmax.f32 %v428_v47, 0.0  ;;  %773 = vmatpush3.msra.mxu0 %v439_v46 }
 0x33d   :  { %774 = vmatprep.subr.mxu0 %v882_v34 }
 0x33e   :  { %775 = vmatpush3.msra.mxu0 %v438_v49 }
 0x33f   :  { %776 = vmatprep.subr.mxu0 %v882_v34 }
 0x340   :  { %777 = vmatpush3.msra.mxu0 %v437_v50 }
 0x341   :  { %778 = vmatprep.subr.mxu0 %v882_v34 }
 0x342   :  { %779 = vmatpush3.msra.mxu0 %v436_v51 }
 0x343   :  { %781 = vmatmul.mubr.msk.f32.vlgmr.msra.gmra.mxu0 %vm338_vm2, %v48_v52  ;;  %794 = vmatprep.subr.mxu0 %v882_v34 }
 0x344   :  { %802 = vmatprep.mubr.msk.f32.mxu0 %vm883_vm3, %v882_v34  ;;  %795 = vmatpush3.msra.mxu0 %v61_v54 }
 0x345   :  { %796 = vmatprep.subr.mxu0 %v882_v34 }
 0x346   :  { %797 = vmatpush3.msra.mxu0 %v60_v57 }
 0x347   :  { %798 = vmatprep.subr.mxu0 %v882_v34 }
 0x348   :  { %799 = vmatpush3.msra.mxu0 %v59_v58 }
 0x349   :  { %800 = vmatprep.subr.mxu0 %v882_v34 }
 0x34a   :  { %801 = vmatpush3.msra.mxu0 %v58_v59 }
 0x403   :  { %v509_v55 = vpop.f32.mrf.mxu0 }
 0x404   :  { %792 = vmatmul.mubr.msk.f32.vlgmr.msra.gmra.mxu1 %vm338_vm2, %v509_v55 }
 0x405   :  { %v782_v56 = vpop.f32.mrf.mxu0 }
 0x4c4   :  { %v586_v62 = vpop.f32.mrf.mxu1 }
 0x4c5   :  { %v587_v63 = vadd.f32 %v586_v62, %v516_v61 }
 0x4c6   :  { %v793_v0 = vpop.f32.mrf.mxu1 }
 0x4c7   :  { %v590_v1 = vmax.f32 %v587_v63, 0.0 }
 0x4c9   :  { %803 = vmatmul.mubr.msk.f32.vlgmr.msra.gmra.mxu0 %vm338_vm2, %v590_v1 }
 0x589   :  { %v664_v4 = vpop.f32.mrf.mxu0 }
 0x58a   :  { %v665_v6 = vadd.f32 %v664_v4, %v594_v3 }
 0x58b   :  { %v804_v8 = vpop.f32.mrf.mxu0 }
 0x58c   :  { %668 = vst [vmem:[#allocation7] sm:$0xff] %v665_v6 }
 0x58d   :  { %863 = shalt.err (!%p860_p0)
}
 0x58e   :  { %678 = dma.vmem_to_hbm [thread:$0]  %s676_s1, 128, %s941_s2, [#allocation4]  }
 0x58f   :  { %876 = dma.done.wait [#allocation4], 128  }
 0x590   :  { %877 = vsyncadd [#allocation4], 4294967168 }
 0x591   :  { %682 = vsyncpa [#allocation3], 1 }
 0x592   :  { %683 = vsyncpa [#allocation6], 1 }
 0x593   :  { %684 = vsyncpa [#allocation4], 1 }

</bundles_post_ra>
